<compile_context>
chip_gen: v6e
topology: v6e:2x2x1
jax: 0.10.0
libtpu: 0.0.40
codegen_flags: <defaults>
</compile_context>

<pallas_src>
import functools

import jax
import jax.numpy as jnp
from jax.experimental import pallas as pl
from jax.experimental.pallas import tpu as pltpu

LEAKY_SLOPE = 0.2
BN_EPS = 1e-5
LANE = 128


def _leaky(x):
    # slope < 1  =>  leaky_relu(x) == max(x, slope*x)
    return jnp.maximum(x, LEAKY_SLOPE * x)


def _round_up(x, m):
    return ((x + m - 1) // m) * m


# --------------------------------------------------------------------------
# Parameter construction (Linear + BatchNorm1d eval stats), matching PyTorch.
# --------------------------------------------------------------------------
def _fold_bn(gamma, beta, mean, var):
    scale = gamma / jnp.sqrt(var + BN_EPS)
    shift = beta - mean * scale
    return scale[None, :], shift[None, :]


def make_params(key, local_channels, global_channels):
    """Deterministic synthetic weights for the two MLPs (Linear + BN per layer)."""
    params = []
    for channels in (local_channels, global_channels):
        layers = []
        for cin, cout in zip(channels[:-1], channels[1:]):
            key, k_w, k_b, k_g, k_be, k_m, k_v = jax.random.split(key, 7)
            w = jax.random.normal(k_w, (cin, cout), jnp.float32) * 0.1
            b = jax.random.normal(k_b, (cout,), jnp.float32) * 0.05
            gamma = 1.0 + 0.1 * jax.random.normal(k_g, (cout,), jnp.float32)
            beta = 0.05 * jax.random.normal(k_be, (cout,), jnp.float32)
            mean = 0.05 * jax.random.normal(k_m, (cout,), jnp.float32)
            var = jnp.abs(jax.random.normal(k_v, (cout,), jnp.float32)) + 0.5
            scale, shift = _fold_bn(gamma, beta, mean, var)
            layers.append((w, b[None, :], scale, shift))
        params.append(layers)
    return params


def _fuse_layer(p):
    """Fold BN into the Linear:  (x@W + b)*s + t == x@(W*s) + (b*s + t)."""
    w, b, s, t = p
    return w * s, b * s + t


# --------------------------------------------------------------------------
# Pallas kernel
# --------------------------------------------------------------------------
def _minipointnet_kernel(
    x_ref,                      # [b_tile, n_tile, C_in]   bf16
    w1, c1, w2, c2,             # fused local layers  (W bf16, c f32; layer 2 padded to 128 lanes)
    gw1, gc1, gw2, gc2,         # fused global layers (gw1 rows padded to 128)
    glob_ref,                   # [b_tile, 1, G2]          f32
    local_ref,                  # [b_tile, n_tile, H2p]    bf16 (lane-dense 128-wide)
    pooled_ref,                 # VMEM scratch [b_tile, H2p] f32 (running max over N tiles)
    *, b_tile, n_tile, c_in, h2p,
):
    n = pl.program_id(1)
    n_last = pl.num_programs(1) - 1

    @pl.when(n == 0)
    def _():
        pooled_ref[...] = jnp.full_like(pooled_ref, -jnp.inf)

    # ---- local_nn: batch tile folded into the matmul M dim -----------------
    # (free reshape: n_tile is a multiple of 8, last dim unchanged)
    x = x_ref[...].reshape(b_tile * n_tile, c_in)
    h = _leaky(jnp.dot(x, w1[...], preferred_element_type=jnp.float32) + c1[...])
    h = _leaky(jnp.dot(h.astype(jnp.bfloat16), w2[...],
                       preferred_element_type=jnp.float32) + c2[...])
    h3 = h.reshape(b_tile, n_tile, h2p)

    local_ref[...] = h3.astype(local_ref.dtype)       # unmasked 128-lane bf16 stores

    # ---- per-batch running max pool over points (aggr='max', batch=None) ---
    pooled_ref[...] = jnp.maximum(pooled_ref[...], jnp.max(h3, axis=1))

    # ---- global_nn on the finished pooled vectors (last N tile only) -------
    @pl.when(n == n_last)
    def _():
        p = pooled_ref[...].astype(jnp.bfloat16)
        g = _leaky(jnp.dot(p, gw1[...], preferred_element_type=jnp.float32) + gc1[...])
        g = _leaky(jnp.dot(g.astype(jnp.bfloat16), gw2[...],
                           preferred_element_type=jnp.float32) + gc2[...])
        glob_ref[...] = g[:, None, :].astype(glob_ref.dtype)


# --------------------------------------------------------------------------
# Wrapper
# --------------------------------------------------------------------------
def mini_pointnet(x, params, *, b_tile=1, n_tile=None):
    """x: [B, N, C_in] f32 -> (global_out [B, G_out] f32, local_out [B, N, H_out] bf16)."""
    B, N, C_in = x.shape
    (l1, l2), (g1, g2) = params
    H1 = l1[0].shape[1]
    H2 = l2[0].shape[1]
    GH1 = g1[0].shape[1]
    G2 = g2[0].shape[1]
    H2p = _round_up(H2, LANE)        # lane-dense local-output width

    if n_tile is None:
        n_tile = N
    assert B % b_tile == 0, "B must be a multiple of b_tile"
    assert N % n_tile == 0, "N must be a multiple of n_tile"
    assert n_tile % 8 == 0 or n_tile == N, "n_tile must be a multiple of 8"

    # Fuse BatchNorm into the Linear layers.
    w1, c1 = _fuse_layer(l1)
    w2, c2 = _fuse_layer(l2)
    gw1, gc1 = _fuse_layer(g1)
    gw2, gc2 = _fuse_layer(g2)

    # Zero-pad the last local layer to 128 output channels (lane-dense stores).
    # Padded activations are exactly 0 (leaky(0)=0) and the matching zero rows
    # appended to gw1 make them contribute nothing to the global MLP.
    if H2p != H2:
        w2 = jnp.pad(w2, ((0, 0), (0, H2p - H2)))
        c2 = jnp.pad(c2, ((0, 0), (0, H2p - H2)))
        gw1 = jnp.pad(gw1, ((0, H2p - H2), (0, 0)))

    # bf16 matmul operands (f32 accumulation in-kernel); bias/shift stay f32.
    w1, w2, gw1, gw2 = (w.astype(jnp.bfloat16) for w in (w1, w2, gw1, gw2))
    weights = [w1, c1, w2, c2, gw1, gc1, gw2, gc2]
    x_bf16 = x.astype(jnp.bfloat16)

    kernel = functools.partial(_minipointnet_kernel,
                               b_tile=b_tile, n_tile=n_tile, c_in=C_in, h2p=H2p)

    grid = (B // b_tile, N // n_tile)
    weight_specs = [pl.BlockSpec(w.shape, lambda b, n: (0, 0)) for w in weights]
    in_specs = [pl.BlockSpec((b_tile, n_tile, C_in), lambda b, n: (b, n, 0))] + weight_specs
    out_specs = [
        pl.BlockSpec((b_tile, 1, G2), lambda b, n: (b, 0, 0)),      # resident across n
        pl.BlockSpec((b_tile, n_tile, H2p), lambda b, n: (b, n, 0)),
    ]
    out_shape = [
        jax.ShapeDtypeStruct((B, 1, G2), jnp.float32),
        jax.ShapeDtypeStruct((B, N, H2p), jnp.bfloat16),
    ]

    flops = int(2 * B * N * (C_in * H1 + H1 * H2p) + 2 * B * (H2p * GH1 + GH1 * G2))
    n_steps = grid[0] * grid[1]
    bytes_accessed = int(
        2 * B * N * C_in                                   # x (bf16)
        + 2 * B * N * H2p                                  # local out (bf16)
        + 4 * B * G2                                       # global out (f32)
        + n_steps * sum(int(w.size) * w.dtype.itemsize for w in weights))

    glob, local = pl.pallas_call(
        kernel,
        grid=grid,
        in_specs=in_specs,
        out_specs=out_specs,
        out_shape=out_shape,
        scratch_shapes=[pltpu.VMEM((b_tile, H2p), jnp.float32)],
        compiler_params=pltpu.CompilerParams(
            dimension_semantics=("parallel", "arbitrary"),
            vmem_limit_bytes=48 * 1024 * 1024),
        cost_estimate=pl.CostEstimate(
            flops=flops, transcendentals=0, bytes_accessed=bytes_accessed),
    )(x_bf16, *weights)

    glob = glob[:, 0, :]
    local = local[:, :, :H2]
    return glob, local

    # TODO(synk): pipeline_mode=pl.Buffered(3) on the x in_spec if profiling on
    # real point clouds shows exposed input DMA (writeback-dominated otherwise).


# --------------------------------------------------------------------------
# Plain-JAX reference matching the PyTorch semantics (batch=None, aggr='max').
# --------------------------------------------------------------------------
def mini_pointnet_ref(x, params):
    (l1, l2), (g1, g2) = params

    def layer(h, p):
        w, b, s, t = p
        return _leaky((h @ w + b) * s + t)

    y = layer(layer(x, l1), l2)          # local_nn output
    g = jnp.max(y, axis=1)               # x.max(1)[0]
    g = layer(layer(g, g1), g2)          # global_nn
    return g, y


if __name__ == "__main__":
    B, N, C_in = 2, 64, 8
    local_channels = [C_in, 32, 64]
    global_channels = [64, 64, 32]

    key = jax.random.PRNGKey(0)
    key, kx = jax.random.split(key)
    x = jax.random.normal(kx, (B, N, C_in), jnp.float32)
    params = make_params(key, local_channels, global_channels)

    # b_tile=1 keeps the parallel batch axis >= 2 steps (v7x megacore);
    # n_tile=32 exercises the running-max accumulator over 2 N-tiles.
    glob_out, local_out = mini_pointnet(x, params, b_tile=1, n_tile=32)
    glob_out = jax.block_until_ready(glob_out)
    local_out = jax.block_until_ready(local_out)

    glob_ref, local_ref = mini_pointnet_ref(x, params)
    assert glob_out.shape == glob_ref.shape
    assert local_out.shape == local_ref.shape
    # bf16 matmul operands / bf16 local writeback -> bf16-level tolerances.
    assert jnp.allclose(glob_out, glob_ref, atol=2e-2, rtol=2e-2), \
        float(jnp.max(jnp.abs(glob_out - glob_ref)))
    assert jnp.allclose(local_out.astype(jnp.float32), local_ref, atol=2e-2, rtol=2e-2), \
        float(jnp.max(jnp.abs(local_out.astype(jnp.float32) - local_ref)))

    # TODO(synk): scatter-based global_max_pool for ragged `batch` index vectors
    # (the batch-is-not-None path) and forward_embedding's gather+concat are not
    # expressed here; only the dense forward path is.
    print("KERNEL_OK")
</pallas_src>

<mosaic_0001>
module attributes {stable_mosaic.version = 11 : i64} {
  func.func @_minipointnet_kernel(%arg0: i32, %arg1: i32, %arg2: memref<1x32x8xbf16, #tpu.memory_space<vmem>>, %arg3: memref<8x32xbf16, #tpu.memory_space<vmem>>, %arg4: memref<1x32xf32, #tpu.memory_space<vmem>>, %arg5: memref<32x128xbf16, #tpu.memory_space<vmem>>, %arg6: memref<1x128xf32, #tpu.memory_space<vmem>>, %arg7: memref<128x64xbf16, #tpu.memory_space<vmem>>, %arg8: memref<1x64xf32, #tpu.memory_space<vmem>>, %arg9: memref<64x32xbf16, #tpu.memory_space<vmem>>, %arg10: memref<1x32xf32, #tpu.memory_space<vmem>>, %arg11: memref<1x1x32xf32, #tpu.memory_space<vmem>>, %arg12: memref<1x32x128xbf16, #tpu.memory_space<vmem>>, %arg13: memref<1x128xf32, #tpu.memory_space<vmem>>) attributes {dimension_semantics = [#tpu.dimension_semantics<parallel>, #tpu.dimension_semantics<arbitrary>], iteration_bounds = array<i64: 2, 2>, scalar_prefetch = 0 : i64, scratch_operands = 1 : i64, tpu.core_type = #tpu.core_type<tc>, window_params = [{transform_indices = @transform_0, window_bounds = array<i64: 1, 32, 8>}, {pipeline_mode = #tpu.pipeline_mode<synchronous>, transform_indices = @transform_1, window_bounds = array<i64: 8, 32>}, {pipeline_mode = #tpu.pipeline_mode<synchronous>, transform_indices = @transform_2, window_bounds = array<i64: 1, 32>}, {pipeline_mode = #tpu.pipeline_mode<synchronous>, transform_indices = @transform_3, window_bounds = array<i64: 32, 128>}, {pipeline_mode = #tpu.pipeline_mode<synchronous>, transform_indices = @transform_4, window_bounds = array<i64: 1, 128>}, {pipeline_mode = #tpu.pipeline_mode<synchronous>, transform_indices = @transform_5, window_bounds = array<i64: 128, 64>}, {pipeline_mode = #tpu.pipeline_mode<synchronous>, transform_indices = @transform_6, window_bounds = array<i64: 1, 64>}, {pipeline_mode = #tpu.pipeline_mode<synchronous>, transform_indices = @transform_7, window_bounds = array<i64: 64, 32>}, {pipeline_mode = #tpu.pipeline_mode<synchronous>, transform_indices = @transform_8, window_bounds = array<i64: 1, 32>}, {transform_indices = @transform_9, window_bounds = array<i64: 1, 1, 32>}, {transform_indices = @transform_10, window_bounds = array<i64: 1, 32, 128>}]} {
    %c0_i32 = arith.constant 0 : i32
    %0 = arith.cmpi eq, %arg1, %c0_i32 : i32
    %1 = arith.extui %0 : i1 to i32
    %c0_i32_0 = arith.constant 0 : i32
    %2 = arith.cmpi ne, %1, %c0_i32_0 : i32
    scf.if %2 {
      %cst_23 = arith.constant 0xFF800000 : f32
      %32 = vector.broadcast %cst_23 : f32 to vector<1x128xf32>
      %c0_24 = arith.constant 0 : index
      %c0_25 = arith.constant 0 : index
      %33 = vector.load %arg13[%c0_24, %c0_25] : memref<1x128xf32, #tpu.memory_space<vmem>>, vector<1x128xf32>
      tpu.vector_store %arg13[%c0_24, %c0_25], %32 {strides = array<i32>} : memref<1x128xf32, #tpu.memory_space<vmem>>, vector<1x128xf32>,
    } else {
    }
    %c0 = arith.constant 0 : index
    %c0_1 = arith.constant 0 : index
    %c0_2 = arith.constant 0 : index
    %3 = vector.load %arg2[%c0, %c0_1, %c0_2] : memref<1x32x8xbf16, #tpu.memory_space<vmem>>, vector<1x32x8xbf16>
    %4 = vector.shape_cast %3 : vector<1x32x8xbf16> to vector<32x8xbf16>
    %c0_3 = arith.constant 0 : index
    %c0_4 = arith.constant 0 : index
    %5 = vector.load %arg3[%c0_3, %c0_4] : memref<8x32xbf16, #tpu.memory_space<vmem>>, vector<8x32xbf16>
    %cst = arith.constant dense<0.000000e+00> : vector<32x32xf32>
    %6 = tpu.matmul %4, %5, %cst {dimension_numbers = #tpu.dot_dimension_numbers<[1], [0], [0], [1], [0, 0, 1, 1], [], []>} : vector<32x8xbf16>, vector<8x32xbf16>, vector<32x32xf32> -> vector<32x32xf32>
    %c0_5 = arith.constant 0 : index
    %c0_6 = arith.constant 0 : index
    %7 = vector.load %arg4[%c0_5, %c0_6] : memref<1x32xf32, #tpu.memory_space<vmem>>, vector<1x32xf32>
    %8 = vector.broadcast %7 : vector<1x32xf32> to vector<32x32xf32>
    %9 = arith.addf %6, %8 : vector<32x32xf32>
    %cst_7 = arith.constant 2.000000e-01 : f32
    %10 = vector.broadcast %cst_7 : f32 to vector<32x32xf32>
    %11 = arith.mulf %10, %9 : vector<32x32xf32>
    %12 = arith.maximumf %9, %11 : vector<32x32xf32>
    %13 = arith.truncf %12 : vector<32x32xf32> to vector<32x32xbf16>
    %c0_8 = arith.constant 0 : index
    %c0_9 = arith.constant 0 : index
    %14 = vector.load %arg5[%c0_8, %c0_9] : memref<32x128xbf16, #tpu.memory_space<vmem>>, vector<32x128xbf16>
    %cst_10 = arith.constant dense<0.000000e+00> : vector<32x128xf32>
    %15 = tpu.matmul %13, %14, %cst_10 {dimension_numbers = #tpu.dot_dimension_numbers<[1], [0], [0], [1], [0, 0, 1, 1], [], []>} : vector<32x32xbf16>, vector<32x128xbf16>, vector<32x128xf32> -> vector<32x128xf32>
    %c0_11 = arith.constant 0 : index
    %c0_12 = arith.constant 0 : index
    %16 = vector.load %arg6[%c0_11, %c0_12] : memref<1x128xf32, #tpu.memory_space<vmem>>, vector<1x128xf32>
    %17 = vector.broadcast %16 : vector<1x128xf32> to vector<32x128xf32>
    %18 = arith.addf %15, %17 : vector<32x128xf32>
    %cst_13 = arith.constant 2.000000e-01 : f32
    %19 = vector.broadcast %cst_13 : f32 to vector<32x128xf32>
    %20 = arith.mulf %19, %18 : vector<32x128xf32>
    %21 = arith.maximumf %18, %20 : vector<32x128xf32>
    %22 = vector.shape_cast %21 : vector<32x128xf32> to vector<1x32x128xf32>
    %23 = arith.truncf %22 : vector<1x32x128xf32> to vector<1x32x128xbf16>
    %c0_14 = arith.constant 0 : index
    %c0_15 = arith.constant 0 : index
    %c0_16 = arith.constant 0 : index
    %24 = vector.load %arg12[%c0_14, %c0_15, %c0_16] : memref<1x32x128xbf16, #tpu.memory_space<vmem>>, vector<1x32x128xbf16>
    tpu.vector_store %arg12[%c0_14, %c0_15, %c0_16], %23 {strides = array<i32>} : memref<1x32x128xbf16, #tpu.memory_space<vmem>>, vector<1x32x128xbf16>,
    %c0_17 = arith.constant 0 : index
    %c0_18 = arith.constant 0 : index
    %25 = vector.load %arg13[%c0_17, %c0_18] : memref<1x128xf32, #tpu.memory_space<vmem>>, vector<1x128xf32>
    %cst_19 = arith.constant dense<0xFF800000> : vector<1x128xf32>
    %26 = vector.multi_reduction <maximumf>, %22, %cst_19 [1] : vector<1x32x128xf32> to vector<1x128xf32>
    %27 = arith.maximumf %25, %26 : vector<1x128xf32>
    %c0_20 = arith.constant 0 : index
    %c0_21 = arith.constant 0 : index
    %28 = vector.load %arg13[%c0_20, %c0_21] : memref<1x128xf32, #tpu.memory_space<vmem>>, vector<1x128xf32>
    tpu.vector_store %arg13[%c0_20, %c0_21], %27 {strides = array<i32>} : memref<1x128xf32, #tpu.memory_space<vmem>>, vector<1x128xf32>,
    %c1_i32 = arith.constant 1 : i32
    %29 = arith.cmpi eq, %arg1, %c1_i32 : i32
    %30 = arith.extui %29 : i1 to i32
    %c0_i32_22 = arith.constant 0 : i32
    %31 = arith.cmpi ne, %30, %c0_i32_22 : i32
    scf.if %31 {
      %c0_23 = arith.constant 0 : index
      %c0_24 = arith.constant 0 : index
      %32 = vector.load %arg13[%c0_23, %c0_24] : memref<1x128xf32, #tpu.memory_space<vmem>>, vector<1x128xf32>
      %33 = arith.truncf %32 : vector<1x128xf32> to vector<1x128xbf16>
      %c0_25 = arith.constant 0 : index
      %c0_26 = arith.constant 0 : index
      %34 = vector.load %arg7[%c0_25, %c0_26] : memref<128x64xbf16, #tpu.memory_space<vmem>>, vector<128x64xbf16>
      %cst_27 = arith.constant dense<0.000000e+00> : vector<1x64xf32>
      %35 = tpu.matmul %33, %34, %cst_27 {dimension_numbers = #tpu.dot_dimension_numbers<[1], [0], [0], [1], [0, 0, 1, 1], [], []>} : vector<1x128xbf16>, vector<128x64xbf16>, vector<1x64xf32> -> vector<1x64xf32>
      %c0_28 = arith.constant 0 : index
      %c0_29 = arith.constant 0 : index
      %36 = vector.load %arg8[%c0_28, %c0_29] : memref<1x64xf32, #tpu.memory_space<vmem>>, vector<1x64xf32>
      %37 = arith.addf %35, %36 : vector<1x64xf32>
      %cst_30 = arith.constant 2.000000e-01 : f32
      %38 = vector.broadcast %cst_30 : f32 to vector<1x64xf32>
      %39 = arith.mulf %38, %37 : vector<1x64xf32>
      %40 = arith.maximumf %37, %39 : vector<1x64xf32>
      %41 = arith.truncf %40 : vector<1x64xf32> to vector<1x64xbf16>
      %c0_31 = arith.constant 0 : index
      %c0_32 = arith.constant 0 : index
      %42 = vector.load %arg9[%c0_31, %c0_32] : memref<64x32xbf16, #tpu.memory_space<vmem>>, vector<64x32xbf16>
      %cst_33 = arith.constant dense<0.000000e+00> : vector<1x32xf32>
      %43 = tpu.matmul %41, %42, %cst_33 {dimension_numbers = #tpu.dot_dimension_numbers<[1], [0], [0], [1], [0, 0, 1, 1], [], []>} : vector<1x64xbf16>, vector<64x32xbf16>, vector<1x32xf32> -> vector<1x32xf32>
      %c0_34 = arith.constant 0 : index
      %c0_35 = arith.constant 0 : index
      %44 = vector.load %arg10[%c0_34, %c0_35] : memref<1x32xf32, #tpu.memory_space<vmem>>, vector<1x32xf32>
      %45 = arith.addf %43, %44 : vector<1x32xf32>
      %cst_36 = arith.constant 2.000000e-01 : f32
      %46 = vector.broadcast %cst_36 : f32 to vector<1x32xf32>
      %47 = arith.mulf %46, %45 : vector<1x32xf32>
      %48 = arith.maximumf %45, %47 : vector<1x32xf32>
      %49 = vector.shape_cast %48 : vector<1x32xf32> to vector<1x1x32xf32>
      %c0_37 = arith.constant 0 : index
      %c0_38 = arith.constant 0 : index
      %c0_39 = arith.constant 0 : index
      %50 = vector.load %arg11[%c0_37, %c0_38, %c0_39] : memref<1x1x32xf32, #tpu.memory_space<vmem>>, vector<1x1x32xf32>
      tpu.vector_store %arg11[%c0_37, %c0_38, %c0_39], %49 {strides = array<i32>} : memref<1x1x32xf32, #tpu.memory_space<vmem>>, vector<1x1x32xf32>,
    } else {
    }
    return
  }
  func.func @transform_0(%arg0: i32, %arg1: i32) -> (i32, i32, i32) {
    %c0_i32 = arith.constant 0 : i32
    %c0_i32_0 = arith.constant 0 : i32
    return %arg0, %arg1, %c0_i32 : i32, i32, i32
  }
  func.func @transform_1(%arg0: i32, %arg1: i32) -> (i32, i32) {
    %c0_i32 = arith.constant 0 : i32
    %c0_i32_0 = arith.constant 0 : i32
    %c0_i32_1 = arith.constant 0 : i32
    return %c0_i32, %c0_i32_0 : i32, i32
  }
  func.func @transform_2(%arg0: i32, %arg1: i32) -> (i32, i32) {
    %c0_i32 = arith.constant 0 : i32
    %c0_i32_0 = arith.constant 0 : i32
    %c0_i32_1 = arith.constant 0 : i32
    return %c0_i32, %c0_i32_0 : i32, i32
  }
  func.func @transform_3(%arg0: i32, %arg1: i32) -> (i32, i32) {
    %c0_i32 = arith.constant 0 : i32
    %c0_i32_0 = arith.constant 0 : i32
    %c0_i32_1 = arith.constant 0 : i32
    return %c0_i32, %c0_i32_0 : i32, i32
  }
  func.func @transform_4(%arg0: i32, %arg1: i32) -> (i32, i32) {
    %c0_i32 = arith.constant 0 : i32
    %c0_i32_0 = arith.constant 0 : i32
    %c0_i32_1 = arith.constant 0 : i32
    return %c0_i32, %c0_i32_0 : i32, i32
  }
  func.func @transform_5(%arg0: i32, %arg1: i32) -> (i32, i32) {
    %c0_i32 = arith.constant 0 : i32
    %c0_i32_0 = arith.constant 0 : i32
    %c0_i32_1 = arith.constant 0 : i32
    return %c0_i32, %c0_i32_0 : i32, i32
  }
  func.func @transform_6(%arg0: i32, %arg1: i32) -> (i32, i32) {
    %c0_i32 = arith.constant 0 : i32
    %c0_i32_0 = arith.constant 0 : i32
    %c0_i32_1 = arith.constant 0 : i32
    return %c0_i32, %c0_i32_0 : i32, i32
  }
  func.func @transform_7(%arg0: i32, %arg1: i32) -> (i32, i32) {
    %c0_i32 = arith.constant 0 : i32
    %c0_i32_0 = arith.constant 0 : i32
    %c0_i32_1 = arith.constant 0 : i32
    return %c0_i32, %c0_i32_0 : i32, i32
  }
  func.func @transform_8(%arg0: i32, %arg1: i32) -> (i32, i32) {
    %c0_i32 = arith.constant 0 : i32
    %c0_i32_0 = arith.constant 0 : i32
    %c0_i32_1 = arith.constant 0 : i32
    return %c0_i32, %c0_i32_0 : i32, i32
  }
  func.func @transform_9(%arg0: i32, %arg1: i32) -> (i32, i32, i32) {
    %c0_i32 = arith.constant 0 : i32
    %c0_i32_0 = arith.constant 0 : i32
    %c0_i32_1 = arith.constant 0 : i32
    return %arg0, %c0_i32, %c0_i32_0 : i32, i32, i32
  }
  func.func @transform_10(%arg0: i32, %arg1: i32) -> (i32, i32, i32) {
    %c0_i32 = arith.constant 0 : i32
    %c0_i32_0 = arith.constant 0 : i32
    return %arg0, %arg1, %c0_i32 : i32, i32, i32
  }
}

</mosaic_0001>

<bundles_post_ra>
// kernel: tpu_custom_call.1
= control target key start
LH: loop header
LB: loop body
LE: loop exit
PB: predicated region body
PF: predicated region fallthrough
CT: control target
= control target key end

     0   :  { %s1707_s0 = inlined_call_operand.vmem [shape: bf16[2,64,8], index: 0, kind: input, shape index: {}]   ;;  %s1708_s1 = inlined_call_operand.vmem [shape: bf16[8,32], index: 1, kind: input, shape index: {}]   ;;  %s1709_s2 = inlined_call_operand.vmem [shape: f32[1,32], index: 2, kind: input, shape index: {}]   ;;  %s1710_s3 = inlined_call_operand.vmem [shape: bf16[32,128], index: 3, kind: input, shape index: {}]   ;;  %s1711_s4 = inlined_call_operand.vmem [shape: f32[1,128], index: 4, kind: input, shape index: {}]   ;;  %s1712_s5 = inlined_call_operand.vmem [shape: bf16[128,64], index: 5, kind: input, shape index: {}]   ;;  %s1713_s6 = inlined_call_operand.vmem [shape: f32[1,64], index: 6, kind: input, shape index: {}]   ;;  %s1714_s7 = inlined_call_operand.vmem [shape: bf16[64,32], index: 7, kind: input, shape index: {}]   ;;  %s1715_s8 = inlined_call_operand.vmem [shape: f32[1,32], index: 8, kind: input, shape index: {}]   ;;  %s1716_s9 = inlined_call_operand.hbm [shape: f32[2,1,32], index: 9, kind: output, shape index: {0}]   ;;  %s1717_s10 = inlined_call_operand.hbm [shape: bf16[2,64,128], index: 10, kind: output, shape index: {1}]  }
   0x1   :  { %1732 = sst [smem:[#allocation21_spill]] %s1707_s0 }
   0x2   :  { %1733 = sst [smem:[#allocation22_spill]] %s1708_s1 }
   0x3   :  { %1734 = sst [smem:[#allocation23_spill]] %s1716_s9 }
   0x4   :  { %1735 = sst [smem:[#allocation24_spill]] %s1717_s10 }
   0x5   :  { %16 = vsyncpa [#allocation4], 0 }
   0x6   :  { %18 = vsyncpa [#allocation4 + $0x1], 0 }
   0x7   :  { %19 = vsyncpa [#allocation6], 0 }
   0x8   :  { %21 = vsyncpa [#allocation6 + $0x1], 0  ;;  %s1413_s13 = smov 0   ;;  %s1415_s14 = smov 0  }
   0x9   :  { %s1417_s15 = smov 0   ;;  %s1419_s16 = smov 0  }
   0xa   :  { %s1421_s17 = smov 0   ;;  %s1423_s18 = smov 0  }
   0xb   :  { %s1425_s19 = smov 0   ;;  %s1427_s20 = smov 0  }
   0xc   :  { %s1429_s21 = smov 0   ;;  %s1431_s22 = smov 0  }
   0xd   :  { %s1433_s23 = smov 0  }
   0xe LB: > { %1736 = sst [smem:[#allocation9_spill]] %s1309_s13  ;;  %s954_s24 = sadd.s32 4294967295, %s1349_s23   ;;  %s1349_s23 = sphi %s1433_s23, %s27_s23   ;;  %s1345_s22 = sphi %s1431_s22, %s1774_s22   ;;  %s1341_s21 = sphi %s1429_s21, %s1773_s21   ;;  %s1337_s20 = sphi %s1427_s20, %s1772_s20   ;;  %s1333_s19 = sphi %s1425_s19, %s1771_s19   ;;  %s1329_s18 = sphi %s1423_s18, %s1770_s18   ;;  %s1325_s17 = sphi %s1421_s17, %s1778_s17   ;;  %s1321_s16 = sphi %s1419_s16, %s1777_s16   ;;  %s1317_s15 = sphi %s1417_s15, %s1768_s15   ;;  %s1313_s14 = sphi %s1415_s14, %s1776_s14   ;;  %s1309_s13 = sphi %s1413_s13, %s1775_s13  }
   0xf   : > { %1737 = sst [smem:[#allocation10_spill]] %s1317_s15  ;;  %s955_s25 = sadd.s32 4294967294, %s1349_s23  }
  0x10   : > { %1738 = sst [smem:[#allocation11_spill]] %s1321_s16  ;;  %s36_s26 = sadd.s32 1, %s1341_s21 }
  0x11   : > { %1739 = sst [smem:[#allocation12_spill]] %s1329_s18  ;;  %s39_s27 = sadd.s32 1, %s1345_s22 }
  0x12   : > { %1740 = sst [smem:[#allocation13_spill]] %s1341_s21  ;;  %p37_p0 = scmp.ge.s32.totalorder %s36_s26, 2 }
  0x13   : > { %1741 = sst [smem:[#allocation14_spill]] %s1345_s22  ;;  %s242_s28 = sadd.s32 1, %s1329_s18 }
  0x14   : > { %p252_p1 = scmp.ne.s32.totalorder %s1329_s18, %s1325_s17  ;;  %p1475_p2 = scmp.eq.s32.totalorder %s954_s24, 3 }
  0x15   : > { %s1780_s26 = smov (%p37_p0, %s36_s26), 0  ;;  %s1782_s27 = smov (!%p37_p0, %s39_s27), %s1345_s22 }
  0x16   : > { %1743 = sst [smem:[#allocation15_spill]] %s1780_s26  ;;  %p1484_p3 = por %p1475_p2, %p252_p1 }
  0x17   : > { %p258_p4 = scmp.ne.s32.totalorder %s1325_s17, %s1321_s16  ;;  %p41_p5 = scmp.ge.s32.totalorder %s1782_s27, 2 }
  0x18   : > { %s1744_s30 = scalar_select %p1484_p3, 1, 0 }
  0x19   : > { %p1490_p6 = scmp.eq.s32.totalorder %s955_s25, 3  ;;  %s266_s12 = ssub.s32 %s1341_s21, %s1780_s26 }
  0x1a   : > { %1745 = sst [smem:[#allocation16_spill]] %s1744_s30  ;;  %s270_s24 = sadd.s32 1, %s1317_s15 }
  0x1b   : > { %s1784_s27 = smov (%p41_p5, %s1782_s27), 0  ;;  %p1501_p7 = por %p1490_p6, %p258_p4 }
  0x1c   : > { %1747 = sst [smem:[#allocation17_spill]] %s1784_s27  ;;  %p280_p8 = scmp.ne.s32.totalorder %s1317_s15, %s1313_s14 }
  0x1d   : > { %s1748_s10 = scalar_select %p1501_p7, 1, 0 }
  0x1e   : > { %s239_s16 = ssub.s32 %s1345_s22, %s1784_s27  ;;  %p286_p9 = scmp.ne.s32.totalorder %s1313_s14, %s1309_s13 }
  0x1f   : > { %p240_p10 = scmp.eq.s32.totalorder %s239_s16, 0  ;;  %s267_s25 = sor.u32 %s266_s12, %s239_s16 }
  0x20   : > { %p268_p11 = scmp.eq.s32.totalorder %s267_s25, 0  ;;  %p1513_p12 = por %p280_p8, %p1475_p2 }
  0x21   : > { %s1518_s26 = scalar_select %p240_p10, %s1329_s18, %s242_s28  }
  0x22   : > { %s1521_s21 = scalar_select %p268_p11, %s1317_s15, %s270_s24  }
  0x23   : > { %1750 = sst [smem:[#allocation18_spill]] %s1518_s26  ;;  %p1525_p13 = por %p286_p9, %p1490_p6 }
  0x24   : > { %1751 = sst [smem:[#allocation19_spill]] %s1521_s21  ;;  %p958_p0 = scmp.ge.s32.totalorder %s1349_s23, 1 }
  0x25   : > { %s1752_s30 = scalar_select %p1525_p13, 1, 0 }
  0x26   : > { %p342_p1 = scmp.lt.s32.totalorder %s1349_s23, 5 }
  0x27   : > { %1753 = sst [smem:[#allocation20_spill]] %s1752_s30 }
  0x28   : > { %p343_p4 = pnand %p958_p0, %p342_p1 }
  0x29   : > { %s379_s16 = sand.u32 (!%p343_p4), 1, %s1325_s17   ;;  %s1730_s28 = sand.u32 (!%p343_p4), 1, %s1313_s14  }
  0x2a   : > { %346 = sbr.rel (%p343_p4) target bundleno = 984 (0x3d8), region = 56  ;;  %s959_s29 = sshll.u32 (!%p343_p4), %s1730_s28, 4 }
  0x2b   : > { %s1536_s11 = sshll.u32 (!%p343_p4), %s1333_s19, 2  ;;  %p389_p2 = scmp.lt.s32.totalorder (!%p343_p4), %s1337_s20, 1 }
  0x2c   : > { %p391_p5 = scmp.lt.s32.totalorder (!%p343_p4), %s1536_s11, 7  ;;  %s1754_s0 = sld [smem:[#allocation21_spill]] (!%p343_p4) }
  0x2d   : > { %s1547_s15 = scalar_lea.vmem (!%p343_p4), [#allocation3], %s379_s16  ;;  %s1549_s30 = scalar_lea.vmem (!%p343_p4), [#allocation5], %s959_s29 }
  0x2e   : > { %p963_p6 = scmp.ne.s32.totalorder (!%p343_p4), %s1333_s19, 0 }
  0x2f   : > { %s390_s12 = scalar_select %p389_p2, %s1337_s20, 1 }
  0x30   : > { %s392_s24 = scalar_select %p391_p5, %s1536_s11, 7 }
  0x31   : > { %s961_s25 = sshll.u32 %s390_s12, 3  ;;  %403 = sbr.rel (%p963_p6) target bundleno = 56 (0x38), region = 60 }
  0x32   : > { %s394_s27 = sadd.s32 %s961_s25, %s392_s24 }
  0x33   : > { %s962_s22 = sshll.u32 %s394_s27, 2 }
  0x34   : > { %s396_s21 = scalar_lea.vmem %s1754_s0, %s962_s22 }
  0x36   : > { %v1351_v0 = vmov -inf  }
  0x37   : > { %404 = vst [vmem:[#allocation2] sm:$0x1] %v1351_v0 }
  0x38 PF: > { %s1755_s1 = sld [smem:[#allocation22_spill]]  ;;  %vm434_vm0 = vcmask 1043456   ;;  %v1187_v2 = vld [vmem:[%s396_s21] sm:$0xff]   ;;  %vm427_vm1 = vcmask 64512   ;;  %v1188_v4 = vld [vmem:[%s396_s21 + $0x8] sm:$0xff]   ;;  %vm520_vm2 = vcmask 261120  }
  0x39   : > { %1037 = vmatprep.mubr.msk.bf16.mxu0 %vm427_vm1, %v1187_v2  ;;  %v1189_v5 = vld [vmem:[%s1710_s3 + $0x8] sm:$0xff]   ;;  %v1190_v6 = vld [vmem:[%s1710_s3] sm:$0xff]   ;;  %p978_p8 = scmp.ne.s32.totalorder %s1333_s19, 1 }
  0x3a   : > { %1041 = vmatprep.subr.bf16.mxu1 %v1189_v5  ;;  %v964_v8 = vld [vmem:[%s1709_s2] ss:$0 sm:$0xff] }
  0x3b   : > { %1042 = vmatpush3.bf16.msra.mxu1 %v1189_v5  ;;  %v969_v26 = vld [vmem:[%s1711_s4] ss:$0 sm:$0xff] }
  0x3c   : > { %1043 = vmatprep.subr.bf16.mxu1 %v1190_v6 }
  0x3e   : > { %v409_v1 = vld [vmem:[%s1755_s1] sm:$0xf] }
  0x3f   : > { %1081 = vmatprep.subr.msk.bf16.mxu0 %vm434_vm0, %v409_v1  ;;  %v436_v3 = vsel %vm434_vm0, %v409_v1, 0  ;;  %1044 = vmatpush3.bf16.msra.mxu1 %v1190_v6  ;;  %v604_v53 = vld [vmem:[#allocation2] sm:$0x1] }
  0x40   : > { %1036 = vmatpush3.bf16.msra.mxu0 %v436_v3 }
  0x43   : > { %1038 = vmatmul.mubr.msk.bf16.vlgmr.msra.gmra.mxu0 %vm427_vm1, %v1188_v4 }
 0x103   : > { %v1039_v7 = vpop.f32.mrf.mxu0 }
 0x104   : > { %v481_v11 = vadd.f32 %v1039_v7, %v964_v8 }
 0x105   : > { %v472_v9 = vpop.f32.mrf.mxu0 }
 0x106   : > { %v473_v10 = vadd.f32 %v964_v8, %v472_v9  ;;  %v489_v18 = vmul.f32 0.2, %v481_v11 }
 0x107   : > { %v1040_v12 = vpop.f32.mrf.mxu0 }
 0x108   : > { %v484_v13 = vadd.f32 %v1040_v12, %v964_v8  ;;  %v487_v15 = vmul.f32 0.2, %v473_v10  ;;  %v493_v23 = vmax.f32 %v481_v11, %v489_v18 }
 0x109   : > { %v475_v14 = vpop.f32.mrf.mxu0 }
 0x10a   : > { %v490_v16 = vmul.f32 0.2, %v484_v13  ;;  %v476_v17 = vadd.f32 %v964_v8, %v475_v14  ;;  %v491_v21 = vmax.f32 %v473_v10, %v487_v15 }
 0x10c   : > { %v488_v19 = vmul.f32 0.2, %v476_v17  ;;  %v494_v20 = vmax.f32 %v484_v13, %v490_v16 }
 0x10e   : > { %v492_v22 = vmax.f32 %v476_v17, %v488_v19  ;;  %v496_v25 = vpack.c.bf16 %v494_v20, %v493_v23 }
 0x110   : > { %v495_v24 = vpack.c.bf16 %v492_v22, %v491_v21 }
 0x112   : > { %1045 = vmatprep.mubr.msk.bf16.mxu1 %vm520_vm2, %v495_v24 }
 0x113   : > { %1046 = vmatmul.mubr.msk.bf16.vlgmr.msra.gmra.mxu1 %vm520_vm2, %v496_v25 }
 0x1d3   : > { %v1047_v27 = vpop.f32.mrf.mxu1 }
 0x1d4   : > { %v570_v28 = vadd.f32 %v1047_v27, %v969_v26 }
 0x1d5   : > { %v561_v29 = vpop.f32.mrf.mxu1 }
 0x1d6   : > { %v562_v30 = vadd.f32 %v969_v26, %v561_v29  ;;  %v578_v32 = vmul.f32 0.2, %v570_v28 }
 0x1d7   : > { %v1048_v31 = vpop.f32.mrf.mxu1 }
 0x1d8   : > { %v573_v33 = vadd.f32 %v1048_v31, %v969_v26  ;;  %v576_v35 = vmul.f32 0.2, %v562_v30  ;;  %v582_v38 = vmax.f32 %v570_v28, %v578_v32 }
 0x1d9   : > { %v564_v34 = vpop.f32.mrf.mxu1 }
 0x1da   : > { %v579_v36 = vmul.f32 0.2, %v573_v33  ;;  %v565_v37 = vadd.f32 %v969_v26, %v564_v34  ;;  %v580_v41 = vmax.f32 %v562_v30, %v576_v35 }
 0x1dc   : > { %v583_v39 = vmax.f32 %v573_v33, %v579_v36  ;;  %v577_v40 = vmul.f32 0.2, %v565_v37 }
 0x1de   : > { %v1011_v42 = vpack.c.bf16 %v583_v39, %v582_v38  ;;  %v581_v43 = vmax.f32 %v565_v37, %v577_v40  ;;  %v606_v44 = vmax.f32 %v582_v38, %v583_v39 }
 0x1e0   : > { %1013 = vst [vmem:[%s1549_s30 + $0x8] sm:$0xff] %v1011_v42   ;;  %v1006_v45 = vpack.c.bf16 %v581_v43, %v580_v41  ;;  %v605_v46 = vmax.f32 %v580_v41, %v581_v43 }
 0x1e2   : > { %1007 = vst [vmem:[%s1549_s30] sm:$0xff] %v1006_v45   ;;  %v607_v47 = vmax.f32 %v605_v46, %v606_v44 }
 0x1e4   : > { %v608_v48 = vrot.slane %v607_v47, 4 }
 0x1e6   : > { %v609_v49 = vmax.f32 %v607_v47, %v608_v48 }
 0x1e8   : > { %v610_v50 = vrot.slane %v609_v49, 2 }
 0x1ea   : > { %v611_v51 = vmax.f32 %v609_v49, %v610_v50 }
 0x1ec   : > { %v612_v52 = vrot.slane %v611_v51, 1 }
 0x1ee   : > { %v613_v54 = vmax.f32 %v611_v51, %v612_v52  ;;  %619 = sbr.rel (%p978_p8) target bundleno = 933 (0x3a5), region = 64 }
 0x1f0   : > { %v614_v55 = vmax.f32 %v604_v53, %v613_v54 }
 0x1f2   : > { %615 = vst [vmem:[#allocation2] sm:$0x1] %v614_v55 }
 0x1f3   : > { %v1191_v56 = vld [vmem:[%s1712_s5 + $0x38] sm:$0xff]   ;;  %v1352_v57 = vmov 0.0   ;;  %v1192_v58 = vld [vmem:[%s1712_s5 + $0x30] sm:$0xff]   ;;  %vm1353_vm3 = vmmov 0   ;;  %v1193_v59 = vld [vmem:[%s1712_s5 + $0x28] sm:$0xff]   ;;  %vm763_vm4 = vcmask 523264  }
 0x1f4   : > { %1049 = vmatprep.subr.bf16.mxu0 %v1352_v57  ;;  %1069 = vmatprep.subr.bf16.mxu1 %v1352_v57  ;;  %v1199_v60 = vld [vmem:[%s1714_s7 + $0x18] sm:$0xff]   ;;  %v1194_v61 = vld [vmem:[%s1712_s5 + $0x20] sm:$0xff]   ;;  %v1200_v62 = vld [vmem:[%s1714_s7 + $0x10] sm:$0xff]   ;;  %vm809_vm5 = vcmask 253952  }
 0x1f5   : > { %1050 = vmatpush3.bf16.msra.mxu0 %v1191_v56  ;;  %1065 = vmatprep.mubr.msk.bf16.mxu0 %vm1353_vm3, %v1352_v57  ;;  %v1195_v63 = vld [vmem:[%s1712_s5 + $0x18] sm:$0xff]   ;;  %v1196_v0 = vld [vmem:[%s1712_s5 + $0x10] sm:$0xff]   ;;  %v1197_v1 = vld [vmem:[%s1712_s5 + $0x8] sm:$0xff]  }
 0x1f6   : > { %1051 = vmatprep.subr.bf16.mxu0 %v1352_v57  ;;  %1077 = vmatprep.mubr.msk.bf16.mxu1 %vm1353_vm3, %v1352_v57  ;;  %v1198_v2 = vld [vmem:[%s1712_s5] sm:$0xff]   ;;  %v1201_v5 = vld [vmem:[%s1714_s7 + $0x8] sm:$0xff]  }
 0x1f7   : > { %1070 = vmatpush3.bf16.msra.mxu1 %v1199_v60  ;;  %v1202_v6 = vld [vmem:[%s1714_s7] sm:$0xff]  }
 0x1f8   : > { %1071 = vmatprep.subr.bf16.mxu1 %v1352_v57  ;;  %v638_v7 = vld [vmem:[%s1713_s6] sm:$0x1] }
 0x1f9   : > { %1052 = vmatpush3.bf16.msra.mxu0 %v1192_v58  ;;  %v620_v3 = vld [vmem:[#allocation2] sm:$0x1] }
 0x1fa   : > { %1053 = vmatprep.subr.bf16.mxu0 %v1352_v57  ;;  %v621_v4 = vpack.c.bf16 %v620_v3, %v620_v3  ;;  %v738_v16 = vld [vmem:[%s1715_s8] sm:$0x1] }
 0x1fb   : > { %1072 = vmatpush3.bf16.msra.mxu1 %v1200_v62 }
 0x1fc   : > { %1073 = vmatprep.subr.bf16.mxu1 %v1352_v57 }
 0x1fd   : > { %1054 = vmatpush3.bf16.msra.mxu0 %v1193_v59 }
 0x1fe   : > { %1055 = vmatprep.subr.bf16.mxu0 %v1352_v57 }
 0x1ff   : > { %1074 = vmatpush3.bf16.msra.mxu1 %v1201_v5 }
 0x200   : > { %1075 = vmatprep.subr.bf16.mxu1 %v1352_v57 }
 0x201   : > { %1056 = vmatpush3.bf16.msra.mxu0 %v1194_v61 }
 0x202   : > { %1057 = vmatprep.subr.bf16.mxu0 %v1352_v57 }
 0x203   : > { %1076 = vmatpush3.bf16.msra.mxu1 %v1202_v6 }
 0x205   : > { %1058 = vmatpush3.bf16.msra.mxu0 %v1195_v63 }
 0x206   : > { %1059 = vmatprep.subr.bf16.mxu0 %v1352_v57 }
 0x209   : > { %1060 = vmatpush3.bf16.msra.mxu0 %v1196_v0 }
 0x20a   : > { %1061 = vmatprep.subr.bf16.mxu0 %v1352_v57 }
 0x20d   : > { %1062 = vmatpush3.bf16.msra.mxu0 %v1197_v1 }
 0x20e   : > { %1063 = vmatprep.subr.bf16.mxu0 %v1352_v57 }
 0x211   : > { %1064 = vmatpush3.bf16.msra.mxu0 %v1198_v2 }
 0x214   : > { %1066 = vmatmul.mubr.bf16.vlgmr.msra.gmra.mxu0 %v621_v4 }
 0x2d4   : > { %v721_v8 = vpop.f32.mrf.mxu0 }
 0x2d5   : > { %v722_v9 = vadd.f32 %v721_v8, %v638_v7 }
 0x2d6   : > { %v1067_v10 = vpop.f32.mrf.mxu0 }
 0x2d7   : > { %v727_v11 = vmul.f32 0.2, %v722_v9 }
 0x2d8   : > { %v724_v12 = vpop.f32.mrf.mxu0 }
 0x2d9   : > { %v728_v13 = vmax.f32 %v722_v9, %v727_v11 }
 0x2da   : > { %v1068_v14 = vpop.f32.mrf.mxu0 }
 0x2db   : > { %v729_v15 = vpack.c.bf16 %v728_v13, %v728_v13 }
 0x2dd   : > { %1078 = vmatmul.mubr.msk.bf16.vlgmr.msra.gmra.mxu1 %vm763_vm4, %v729_v15 }
 0x39d   : > { %v801_v17 = vpop.f32.mrf.mxu1 }
 0x39e   : > { %v802_v18 = vadd.f32 %v801_v17, %v738_v16 }
 0x39f   : > { %v1079_v19 = vpop.f32.mrf.mxu1 }
 0x3a0   : > { %v807_v20 = vmul.f32 0.2, %v802_v18 }
 0x3a1   : > { %v804_v21 = vpop.f32.mrf.mxu1 }
 0x3a2   : > { %v808_v22 = vmax.f32 %v802_v18, %v807_v20 }
 0x3a3   : > { %v1080_v23 = vpop.f32.mrf.mxu1 }
 0x3a4   : > { %810 = vst.msk [vmem:[%s1547_s15] sm:$0x1] %vm809_vm5, %v808_v22 }
 0x3a5 PF: > { %s993_s19 = sshll.u32 %s1337_s20, 4  ;;  %s1757_s13 = sld [smem:[#allocation23_spill]] }
 0x3a6   : > { %s829_s29 = sshll.u32 %s1547_s15, 4  ;;  %s812_s12 = scalar_lea.sflag [#allocation4], %s379_s16  ;;  %s830_s29 = int_to_ptr.vmem [resolvable:$true] %s829_s29 }
 0x3a7   : > { %s1203_s24 = scalar_lea.vmem %s830_s29, 16  ;;  %s1354_s25 = smov [#allocation3]  }
 0x3a8   : > { %p1204_p9 = scmp.ne.s32.totalorder %s830_s29, %s1203_s24  ;;  %s1207_s18 = sshll.u32 %s1354_s25, 4  ;;  %s1208_s18 = int_to_ptr.vmem [resolvable:$false] %s1207_s18 }
 0x3a9   : > { %s1209_s0 = scalar_lea.vmem %s1208_s18, 32  ;;  %p1210_p0 = scmp.lt.s32.totalorder %s830_s29, %s1208_s18 }
 0x3aa   : > { %p1205_p10 = pnand %p1204_p9, %p1484_p3  ;;  %p1211_p1 = scmp.lt.s32.totalorder %s1209_s0, %s1203_s24 }
 0x3ab   : > { %s1758_s28 = smov %s1757_s13  ;;  %s827_s21 = scalar_lea.hbm %s1757_s13, %s993_s19 }
 0x3ac   : > { %p1206_p11 = pneg %p1205_p10  ;;  %p1212_p4 = por %p1211_p1, %p1210_p0 }
 0x3ae   : > { %p1213_p2 = pnand %p1212_p4, %p1206_p11 }
 0x3b0   : > { %1216 = shalt.err (!%p1213_p2)
}
 0x3b1   : > { %s1217_s26 = scalar_lea.hbm %s827_s21, 16  ;;  %s1221_s19 = scalar_lea.hbm %s1758_s28, 32 }
 0x3b2   : > { %p1218_p5 = scmp.ne.s32.totalorder %s827_s21, %s1217_s26  ;;  %p1222_p9 = scmp.lt.s32.totalorder %s827_s21, %s1758_s28 }
 0x3b3   : > { %p1223_p10 = scmp.lt.s32.totalorder %s1221_s19, %s1217_s26 }
 0x3b4   : > { %p1219_p6 = pnand %p1218_p5, %p1484_p3 }
 0x3b5   : > { %p1224_p13 = por %p1223_p10, %p1222_p9 }
 0x3b6   : > { %p1220_p8 = pneg %p1219_p6 }
 0x3b8   : > { %p1225_p7 = pnand %p1224_p13, %p1220_p8 }
 0x3ba   : > { %1228 = shalt.err (!%p1225_p7)
}
 0x3bb   : > { %1082 = dma.vmem_to_hbm [thread:$0]  (%p1484_p3), %s830_s29, 16, %s827_s21, %s812_s12  }
 0x3bc   : > { %s995_s0 = sshll.u32 %s1337_s20, 3  ;;  %s844_s24 = sshll.u32 %s1549_s30, 4  ;;  %s1635_s24 = int_to_ptr.vmem [resolvable:$true] %s844_s24 }
 0x3bd   : > { %s841_s25 = sadd.s32 %s995_s0, %s1536_s11  ;;  %s1759_s16 = sld [smem:[#allocation24_spill]] }
 0x3be   : > { %s996_s18 = sshll.u32 %s841_s25, 6  ;;  %s1761_s22 = sand.u32 1, %s1313_s14  }
 0x3bf   : > { %s1644_s13 = scalar_lea.sflag [#allocation6], %s1761_s22  ;;  %s1229_s1 = scalar_lea.vmem %s1635_s24, 256 }
 0x3c0   : > { %p1230_p7 = scmp.ne.s32.totalorder %s1635_s24, %s1229_s1  ;;  %s1355_s20 = smov [#allocation5]  }
 0x3c1   : > { %s1233_s30 = sshll.u32 %s1355_s20, 4  ;;  %s1234_s30 = int_to_ptr.vmem [resolvable:$false] %s1233_s30 }
 0x3c2   : > { %p1231_p3 = pnand %p1230_p7, %p1513_p12  ;;  %s1235_s11 = scalar_lea.vmem %s1234_s30, 512 }
 0x3c3   : > { %s1760_s27 = smov %s1759_s16  ;;  %s1640_s19 = scalar_lea.hbm %s1759_s16, %s996_s18 }
 0x3c4   : > { %p1232_p13 = pneg %p1231_p3  ;;  %p1236_p11 = scmp.lt.s32.totalorder %s1635_s24, %s1234_s30 }
 0x3c5   : > { %p1237_p0 = scmp.lt.s32.totalorder %s1235_s11, %s1229_s1 }
 0x3c7   : > { %p1238_p1 = por %p1237_p0, %p1236_p11 }
 0x3c9   : > { %p1239_p4 = pnand %p1238_p1, %p1232_p13 }
 0x3cb   : > { %1242 = shalt.err (!%p1239_p4)
}
 0x3cc   : > { %s1243_s21 = scalar_lea.hbm %s1640_s19, 256  ;;  %s1247_s0 = scalar_lea.hbm %s1760_s27, 1024 }
 0x3cd   : > { %p1244_p2 = scmp.ne.s32.totalorder %s1640_s19, %s1243_s21  ;;  %p1248_p8 = scmp.lt.s32.totalorder %s1640_s19, %s1760_s27 }
 0x3ce   : > { %p1249_p9 = scmp.lt.s32.totalorder %s1247_s0, %s1243_s21 }
 0x3cf   : > { %p1245_p5 = pnand %p1244_p2, %p1513_p12 }
 0x3d0   : > { %p1250_p10 = por %p1249_p9, %p1248_p8 }
 0x3d1   : > { %p1246_p6 = pneg %p1245_p5 }
 0x3d3   : > { %p1251_p7 = pnand %p1250_p10, %p1246_p6 }
 0x3d5   : > { %1254 = shalt.err (!%p1251_p7)
}
 0x3d6   : > { %s1356_s1 = smov 64   ;;  %s1357_s26 = smov 4  }
 0x3d7   : > { %1083 = dma.vmem_to_hbm [thread:$0]  (%p1513_p12), %s1635_s24, 256, %s1640_s19, %s1644_s13, %s1356_s1, %s1356_s1, %s1357_s26  }
 0x3d8 PF: > { %s1762_s15 = sld [smem:[#allocation11_spill]]  ;;  %p1093_p3 = scmp.ge.s32.totalorder %s1349_s23, 2 }
 0x3d9   : > { %p1763_p13 = scmp.ne.s32.totalorder %s1748_s10, 0 }
 0x3db   : > { %p1087_p11 = pnand %p1093_p3, %p1763_p13 }
 0x3dd   : > { %p1088_p0 = pneg %p1087_p11 }
 0x3de   : > { %s859_s16 = sand.u32 1, %s1762_s15  }
 0x3df   : > { %s860_s22 = scalar_lea.sflag [#allocation4], %s859_s16 }
 0x3e0   : > { %1300 = dma.done.wait (%p1088_p0), %s860_s22, 16  }
 0x3e1   : > { %1302 = vsyncadd (%p1088_p0), %s860_s22, 4294967280  ;;  %s1764_s20 = sld [smem:[#allocation9_spill]] }
 0x3e2   : > { %s1765_s30 = sld [smem:[#allocation20_spill]] }
 0x3e7   : > { %s867_s11 = sand.u32 1, %s1764_s20  }
 0x3e8   : > { %p1766_p1 = scmp.ne.s32.totalorder %s1765_s30, 0  ;;  %s868_s9 = scalar_lea.sflag [#allocation6], %s867_s11 }
 0x3ea   : > { %p1090_p4 = pnand %p1093_p3, %p1766_p1 }
 0x3ec   : > { %p1091_p2 = pneg %p1090_p4 }
 0x3ee   : > { %1304 = dma.done.wait (%p1091_p2), %s868_s9, 256  }
 0x3ef   : > { %1306 = vsyncadd (%p1091_p2), %s868_s9, 4294967040  ;;  %s27_s23 = sadd.s32 1, %s1349_s23   ;;  %s1767_s24 = sld [smem:[#allocation10_spill]] }
 0x3f0   : > { %p24_p12 = scmp.ge.s32.totalorder %s27_s23, 6   ;;  %s1768_s15 = sld [smem:[#allocation19_spill]] }
 0x3f1   : > { %s1769_s10 = sld [smem:[#allocation12_spill]]  ;;  %s1775_s13 = smov %s1313_s14 }
 0x3f2   : > { %s1770_s18 = sld [smem:[#allocation18_spill]]  ;;  %s1777_s16 = smov %s1325_s17 }
 0x3f3   : > { %s1771_s19 = sld [smem:[#allocation13_spill]]  ;;  %26 = sbr.rel (!%p24_p12) target bundleno = 14 (0xe), region = 116 }
 0x3f4   : > { %s1772_s20 = sld [smem:[#allocation14_spill]] }
 0x3f5   : > { %s1773_s21 = sld [smem:[#allocation15_spill]]  ;;  %s1776_s14 = smov %s1767_s24 }
 0x3f6   : > { %s1774_s22 = sld [smem:[#allocation17_spill]] }
 0x3f7   : > { %s1778_s17 = smov %s1769_s10 }
 0x3f8   :  { %873 = vsyncpa [#allocation4], 1 }
 0x3f9   :  { %875 = vsyncpa [#allocation4 + $0x1], 1 }
 0x3fa   :  { %876 = vsyncpa [#allocation6], 1 }
 0x3fb   :  { %878 = vsyncpa [#allocation6 + $0x1], 1 }

</bundles_post_ra>
